<compile_context>
chip_gen: v7x
topology: tpu7x:2x2x1
jax: 0.10.0
libtpu: 0.0.40
codegen_flags: <defaults>
</compile_context>

<pallas_src>
import numpy as np
import jax
import jax.numpy as jnp
from jax import lax
from jax.experimental import pallas as pl
from jax.experimental.pallas import tpu as pltpu

_TAPS = 7          # 1x7 / 7x1 kernels, padding 3
_HALF = _TAPS // 2

# -----------------------------------------------------------------------------
# pltpu.roll direction probe (cached).  Returns `sign` such that
#   pltpu.roll(x, (sign * off) % n, axis=-1)[..., r] == x[..., (r + off) % n]
# -----------------------------------------------------------------------------
_ROLL_SIGN = None


def _roll_sign():
    global _ROLL_SIGN
    if _ROLL_SIGN is None:
        def k(x_ref, o_ref):
            o_ref[...] = pltpu.roll(x_ref[...], 1, axis=1)

        x = jnp.tile(jnp.arange(128, dtype=jnp.float32)[None, :], (8, 1))
        out = np.asarray(pl.pallas_call(
            k, out_shape=jax.ShapeDtypeStruct((8, 128), jnp.float32))(x))
        xn = np.asarray(x)
        if np.array_equal(out, np.roll(xn, 1, axis=1)):
            _ROLL_SIGN = -1          # pltpu.roll(x, s)[r] == x[r - s]   (np.roll)
        elif np.array_equal(out, np.roll(xn, -1, axis=1)):
            _ROLL_SIGN = 1           # pltpu.roll(x, s)[r] == x[r + s]
        else:
            raise RuntimeError("unexpected pltpu.roll semantics")
    return _ROLL_SIGN


# -----------------------------------------------------------------------------
# Fused Inception_B kernel.  One grid step processes one image in a channels-first
# (C, H*W) layout; all intermediates are compiler-managed register/VMEM values.
# -----------------------------------------------------------------------------
def _make_inception_b_kernel(hw, w, c_b1, c_b2a, has_sc_conv, roll_sign):
    def kernel(x_ref, w1_ref, b1_ref, w17_ref, b17_ref, wm_ref,
               w71_ref, b71_ref, hm_ref, wl_ref, o_ref):
        x = x_ref[0]                                             # (cin, hw), lane-dense
        xb = x.astype(jnp.bfloat16)

        # ---- fused 1x1 convs [branch1 | branch2a | shortcut-conv?], BN scale folded ----
        y = jnp.dot(w1_ref[...], xb,
                    preferred_element_type=jnp.float32) + b1_ref[...]
        out1 = jnp.clip(y[:c_b1], 0.0, 6.0)                      # ReLU6
        t2a = jnp.clip(y[c_b1:c_b1 + c_b2a], 0.0, 6.0)           # ReLU6
        if has_sc_conv:
            sc = y[c_b1 + c_b2a:]                                # conv + BN, no act
        else:
            sc = x.astype(jnp.float32)                           # identity shortcut

        def tap_conv(src, w_ref, m_ref, step):
            # 7-tap 1-D conv along the flattened spatial axis: tap j reads the
            # activation shifted by (j-3)*step positions (lane roll), zeroed outside
            # the image by a precomputed boundary mask, then channel-mixed on the MXU.
            acc = None
            for j in range(_TAPS):
                off = j - _HALF
                if off == 0:
                    tap = src
                else:
                    shift = (roll_sign * off * step) % hw
                    tap = pltpu.roll(src, shift, axis=1) * m_ref[j]
                term = jnp.dot(w_ref[j], tap.astype(jnp.bfloat16),
                               preferred_element_type=jnp.float32)
                acc = term if acc is None else acc + term
            return acc

        # ---- branch2b: 1x7 conv (shift along W, pad 3) ----
        t2b = jnp.clip(tap_conv(t2a, w17_ref, wm_ref, 1) + b17_ref[...], 0.0, 6.0)
        # ---- branch2c: 7x1 conv (shift along H, pad 3) ----
        out2 = jnp.clip(tap_conv(t2b, w71_ref, hm_ref, w) + b71_ref[...], 0.0, 6.0)

        # ---- conv_linear (single K = c_b1 + c_b71 GEMM) + residual + ReLU ----
        cat = jnp.concatenate([out1, out2], axis=0).astype(jnp.bfloat16)
        lin = jnp.dot(wl_ref[...], cat, preferred_element_type=jnp.float32)
        o_ref[0] = jnp.maximum(lin + sc, 0.0).astype(o_ref.dtype)

    return kernel


# -----------------------------------------------------------------------------
# Wrapper: NCHW in/out (no transposes), weight packing, grid/BlockSpec setup.
# -----------------------------------------------------------------------------
def inception_b_forward(x_nchw, p):
    n, cin, h, w = x_nchw.shape
    hw = h * w

    c_b1 = p["w_b1"].shape[-1]
    c_b2a = p["w_b2a"].shape[-1]
    c_b17 = p["w_b2b"].shape[-1]
    c_b71 = p["w_b2c"].shape[-1]
    c_lin = p["w_lin"].shape[-1]
    has_sc_conv = "w_sc" in p
    if not has_sc_conv:
        assert cin == c_lin, "identity shortcut requires in_channels == n1_linear"

    # ---- weight packing: fold BN scale into weights, transpose to (cout, cin), bf16 ----
    w1_list = [p["w_b1"] * p["s_b1"], p["w_b2a"] * p["s_b2a"]]
    b1_list = [p["b_b1"], p["b_b2a"]]
    if has_sc_conv:
        w1_list.append(p["w_sc"] * p["s_sc"])
        b1_list.append(p["b_sc"])
    w1_t = jnp.concatenate(w1_list, axis=-1).T.astype(jnp.bfloat16)    # (c1cat, cin)
    b1 = jnp.concatenate(b1_list, axis=-1).reshape(-1, 1)              # (c1cat, 1) f32
    c1cat = w1_t.shape[0]

    w17_t = jnp.transpose(p["w_b2b"] * p["s_b2b"], (0, 2, 1)).astype(jnp.bfloat16)
    b17 = p["b_b2b"].reshape(-1, 1)                                    # (c_b17, 1)
    w71_t = jnp.transpose(p["w_b2c"] * p["s_b2c"], (0, 2, 1)).astype(jnp.bfloat16)
    b71 = p["b_b2c"].reshape(-1, 1)                                    # (c_b71, 1)
    wl_t = p["w_lin"].T.astype(jnp.bfloat16)                           # (c_lin, b1+b2_7x1)

    # ---- precomputed per-tap boundary masks (compile-time constants, tiny inputs) ----
    pos = np.arange(hw)
    colw = pos % w
    rowh = pos // w
    wmask = np.stack([((colw + (j - _HALF) >= 0) & (colw + (j - _HALF) < w))
                      for j in range(_TAPS)]).astype(np.float32).reshape(_TAPS, 1, hw)
    hmask = np.stack([((rowh + (j - _HALF) >= 0) & (rowh + (j - _HALF) < h))
                      for j in range(_TAPS)]).astype(np.float32).reshape(_TAPS, 1, hw)
    wmask = jnp.asarray(wmask)
    hmask = jnp.asarray(hmask)

    # Channels-first flat layout (lane dim = H*W) — metadata reshape only, no transpose.
    x3 = x_nchw.reshape(n, cin, hw)
    if has_sc_conv:
        x3 = x3.astype(jnp.bfloat16)   # halves input DMA; shortcut is the conv path

    kernel = _make_inception_b_kernel(hw, w, c_b1, c_b2a, has_sc_conv, _roll_sign())

    out3 = pl.pallas_call(
        kernel,
        out_shape=jax.ShapeDtypeStruct((n, c_lin, hw), jnp.float32),
        grid=(n,),   # one image per step -> >=2 steps whenever batch >= 2
        in_specs=[
            pl.BlockSpec((1, cin, hw), lambda i: (i, 0, 0)),
            pl.BlockSpec((c1cat, cin), lambda i: (0, 0)),
            pl.BlockSpec((c1cat, 1), lambda i: (0, 0)),
            pl.BlockSpec((_TAPS, c_b17, c_b2a), lambda i: (0, 0, 0)),
            pl.BlockSpec((c_b17, 1), lambda i: (0, 0)),
            pl.BlockSpec((_TAPS, 1, hw), lambda i: (0, 0, 0)),
            pl.BlockSpec((_TAPS, c_b71, c_b17), lambda i: (0, 0, 0)),
            pl.BlockSpec((c_b71, 1), lambda i: (0, 0)),
            pl.BlockSpec((_TAPS, 1, hw), lambda i: (0, 0, 0)),
            pl.BlockSpec((c_lin, c_b1 + c_b71), lambda i: (0, 0)),
        ],
        out_specs=pl.BlockSpec((1, c_lin, hw), lambda i: (i, 0, 0)),
        compiler_params=pltpu.CompilerParams(
            dimension_semantics=("parallel",),
            vmem_limit_bytes=32 * 1024 * 1024),
    )(x3, w1_t, b1, w17_t, b17, wmask, w71_t, b71, hmask, wl_t)

    return out3.reshape(n, c_lin, h, w)


# -----------------------------------------------------------------------------
# Deterministic parameter construction (folded BN) + pure-JAX f32 reference.
# -----------------------------------------------------------------------------
def _fold_bn(conv_bias, gamma, beta, mean, var, eps=1e-5):
    s = gamma / jnp.sqrt(var + eps)
    b = (conv_bias - mean) * s + beta
    return s.reshape(1, -1), b.reshape(1, -1)


def init_params(key, in_ch, b1, b2_1x1, b2_1x7, b2_7x1, n1_linear):
    keys = iter(jax.random.split(key, 64))

    def conv_bn(cin, cout, taps):
        shape = (cin, cout) if taps == 1 else (taps, cin, cout)
        wgt = 0.05 * jax.random.normal(next(keys), shape, jnp.float32)
        cb = 0.1 * jax.random.normal(next(keys), (cout,), jnp.float32)
        gamma = 1.0 + 0.1 * jax.random.normal(next(keys), (cout,), jnp.float32)
        beta = 0.1 * jax.random.normal(next(keys), (cout,), jnp.float32)
        mean = 0.1 * jax.random.normal(next(keys), (cout,), jnp.float32)
        var = 0.5 + jnp.abs(jax.random.normal(next(keys), (cout,), jnp.float32))
        s, b = _fold_bn(cb, gamma, beta, mean, var)
        return wgt, s, b

    p = {}
    p["w_b1"], p["s_b1"], p["b_b1"] = conv_bn(in_ch, b1, 1)
    p["w_b2a"], p["s_b2a"], p["b_b2a"] = conv_bn(in_ch, b2_1x1, 1)
    p["w_b2b"], p["s_b2b"], p["b_b2b"] = conv_bn(b2_1x1, b2_1x7, _TAPS)   # 1x7
    p["w_b2c"], p["s_b2c"], p["b_b2c"] = conv_bn(b2_1x7, b2_7x1, _TAPS)   # 7x1
    # conv_linear: 1x1, bias=False, no BN
    p["w_lin"] = 0.05 * jax.random.normal(next(keys), (b1 + b2_7x1, n1_linear),
                                          jnp.float32)
    # short_cut: 1x1 conv (bias=False) + BN only if channel counts differ
    if in_ch != n1_linear:
        wgt = 0.05 * jax.random.normal(next(keys), (in_ch, n1_linear), jnp.float32)
        gamma = 1.0 + 0.1 * jax.random.normal(next(keys), (n1_linear,), jnp.float32)
        beta = 0.1 * jax.random.normal(next(keys), (n1_linear,), jnp.float32)
        mean = 0.1 * jax.random.normal(next(keys), (n1_linear,), jnp.float32)
        var = 0.5 + jnp.abs(jax.random.normal(next(keys), (n1_linear,), jnp.float32))
        s, b = _fold_bn(jnp.zeros((n1_linear,), jnp.float32), gamma, beta, mean, var)
        p["w_sc"], p["s_sc"], p["b_sc"] = wgt, s, b
    return p


def _ref_conv(x, wgt, kh, kw, ph, pw, s=None, b=None):
    cin = x.shape[-1]
    cout = wgt.shape[-1]
    wk = wgt.reshape(kh, kw, cin, cout)
    y = lax.conv_general_dilated(
        x, wk, (1, 1), ((ph, ph), (pw, pw)),
        dimension_numbers=("NHWC", "HWIO", "NHWC"))
    if s is not None:
        y = y * s.reshape(1, 1, 1, -1) + b.reshape(1, 1, 1, -1)
    return y


def inception_b_reference(x_nchw, p):
    x = jnp.transpose(x_nchw, (0, 2, 3, 1))
    relu6 = lambda v: jnp.clip(v, 0.0, 6.0)
    out1 = relu6(_ref_conv(x, p["w_b1"], 1, 1, 0, 0, p["s_b1"], p["b_b1"]))
    t = relu6(_ref_conv(x, p["w_b2a"], 1, 1, 0, 0, p["s_b2a"], p["b_b2a"]))
    t = relu6(_ref_conv(t, p["w_b2b"], 1, _TAPS, 0, 3, p["s_b2b"], p["b_b2b"]))
    t = relu6(_ref_conv(t, p["w_b2c"], _TAPS, 1, 3, 0, p["s_b2c"], p["b_b2c"]))
    cat = jnp.concatenate([out1, t], axis=-1)
    lin = _ref_conv(cat, p["w_lin"], 1, 1, 0, 0)
    if "w_sc" in p:
        sc = _ref_conv(x, p["w_sc"], 1, 1, 0, 0, p["s_sc"], p["b_sc"])
    else:
        sc = x
    out = jnp.maximum(lin + sc, 0.0)
    return jnp.transpose(out, (0, 3, 1, 2))


if __name__ == "__main__":
    # Inception_B(in_channels=32, b1=32, b2_1x1=32, b2_1x7=32, b2_7x1=32,
    # n1_linear=64) applied to x of shape (2, 32, 16, 16) NCHW.
    N, C, H, W = 2, 32, 16, 16
    b1, b2_1x1, b2_1x7, b2_7x1, n1_linear = 32, 32, 32, 32, 64

    key = jax.random.PRNGKey(0)
    kx, kp = jax.random.split(key)
    x = jax.random.normal(kx, (N, C, H, W), jnp.float32)
    params = init_params(kp, C, b1, b2_1x1, b2_1x7, b2_7x1, n1_linear)

    out = jax.block_until_ready(inception_b_forward(x, params))
    ref = jax.block_until_ready(inception_b_reference(x, params))

    assert out.shape == (N, n1_linear, H, W), out.shape
    max_err = float(jnp.max(jnp.abs(out - ref)))
    # bf16 MXU feeds with f32 accumulation -> loosened tolerance vs f32 reference.
    assert jnp.allclose(out, ref, atol=5e-2, rtol=5e-2), max_err
    print("KERNEL_OK")
</pallas_src>

<mosaic_0001>
module attributes {stable_mosaic.version = 11 : i64} {
  func.func @k(%arg0: memref<8x128xf32, #tpu.memory_space<vmem>>, %arg1: memref<8x128xf32, #tpu.memory_space<vmem>>) attributes {dimension_semantics = [], scalar_prefetch = 0 : i64, scratch_operands = 0 : i64, tpu.core_type = #tpu.core_type<tc>} {
    %c0 = arith.constant 0 : index
    %c0_0 = arith.constant 0 : index
    %0 = vector.load %arg0[%c0, %c0_0] : memref<8x128xf32, #tpu.memory_space<vmem>>, vector<8x128xf32>
    %c1_i32 = arith.constant 1 : i32
    %1 = tpu.dynamic_rotate %0 by %c1_i32 dim 1 : vector<8x128xf32>, i32 -> vector<8x128xf32>
    %c0_1 = arith.constant 0 : index
    %c0_2 = arith.constant 0 : index
    %2 = vector.load %arg1[%c0_1, %c0_2] : memref<8x128xf32, #tpu.memory_space<vmem>>, vector<8x128xf32>
    tpu.vector_store %arg1[%c0_1, %c0_2], %1 {strides = array<i32>} : memref<8x128xf32, #tpu.memory_space<vmem>>, vector<8x128xf32>,
    return
  }
}

</mosaic_0001>

<bundles_post_ra>
// kernel: tpu_custom_call.1
= control target key start
LH: loop header
LB: loop body
LE: loop exit
PB: predicated region body
PF: predicated region fallthrough
CT: control target
= control target key end

     0   :  { %6 = vsyncpa [#allocation3], 0  ;;  %s128_s0 = inlined_call_operand.hbm [shape: f32[8,128], index: 0, kind: input, shape index: {}]   ;;  %s129_s1 = inlined_call_operand.hbm [shape: f32[8,128], index: 1, kind: output, shape index: {}]  }
   0x1   :  { %7 = vsyncpa [#allocation4], 0  ;;  %s91_s6 = smov [#allocation2]   ;;  %s43_s10 = scalar_lea.hbm %s128_s0, 128 }
   0x2   :  { %s14_s7 = sshll.u32 %s91_s6, 4  ;;  %p44_p0 = scmp.ne.s32.totalorder %s128_s0, %s43_s10  ;;  %s15_s7 = int_to_ptr.vmem [resolvable:$true] %s14_s7 }
   0x3   :  { %p47_p1 = scmp.lt.u32.totalorder %s43_s10, %s128_s0 }
   0x5   :  { %p49_p2 = pnand %p47_p1, %p44_p0 }
   0x7   :  { %52 = shalt.err (!%p49_p2)
}
   0x8   :  { %s53_s15 = scalar_lea.vmem %s15_s7, 128  ;;  %p58_p4 = scmp.lt.s32.totalorder %s15_s7, %s15_s7 }
   0x9   :  { %p54_p3 = scmp.ne.s32.totalorder %s15_s7, %s53_s15  ;;  %p59_p5 = scmp.lt.s32.totalorder %s53_s15, %s53_s15 }
   0xb   :  { %p60_p6 = por %p59_p5, %p58_p4 }
   0xd   :  { %p61_p7 = pnand %p60_p6, %p54_p3 }
   0xf   :  { %64 = shalt.err (!%p61_p7)
}
  0x10   :  { %17 = dma.hbm_to_vmem [thread:$0]  %s128_s0, 128, %s15_s7, [#allocation3]  }
  0x11   :  { %87 = dma.done.wait [#allocation3], 128  }
  0x12   :  { %88 = vsyncadd [#allocation3], 4294967168  ;;  %v21_v0 = vld [vmem:[#allocation2] sm:$0xff]  ;;  %s92_s18 = smov 1   ;;  %s93_s19 = smov [#allocation5]  }
  0x13   :  { %22 = vrot.lane.b32.xlu0 %v21_v0, %s92_s18  ;;  %s31_s20 = sshll.u32 %s93_s19, 4  ;;  %s32_s20 = int_to_ptr.vmem [resolvable:$true] %s31_s20 }
  0x14   :  { %s65_s21 = scalar_lea.vmem %s32_s20, 128  ;;  %p70_p9 = scmp.lt.s32.totalorder %s32_s20, %s32_s20 }
  0x15   :  { %p66_p8 = scmp.ne.s32.totalorder %s32_s20, %s65_s21  ;;  %p71_p10 = scmp.lt.s32.totalorder %s65_s21, %s65_s21 }
  0x17   :  { %p72_p11 = por %p71_p10, %p70_p9 }
  0x19   :  { %p73_p12 = pnand %p72_p11, %p66_p8 }
  0x85   :  { %v23_v1 = vpop.permute.xlu0 %22 }
  0x86   :  { %24 = vst [vmem:[#allocation5] sm:$0xff] %v23_v1 }
  0x87   :  { %76 = shalt.err (!%p73_p12)
}
  0x88   :  { %s77_s0 = scalar_lea.hbm %s129_s1, 128 }
  0x89   :  { %p78_p13 = scmp.ne.s32.totalorder %s129_s1, %s77_s0  ;;  %p81_p0 = scmp.lt.u32.totalorder %s77_s0, %s129_s1 }
  0x8b   :  { %p83_p1 = pnand %p81_p0, %p78_p13 }
  0x8d   :  { %86 = shalt.err (!%p83_p1)
}
  0x8e   :  { %34 = dma.vmem_to_hbm [thread:$0]  %s32_s20, 128, %s129_s1, [#allocation4]  }
  0x8f   :  { %89 = dma.done.wait [#allocation4], 128  }
  0x90   :  { %90 = vsyncadd [#allocation4], 4294967168 }
  0x91   :  { %38 = vsyncpa [#allocation3], 1 }
  0x92   :  { %39 = vsyncpa [#allocation4], 1 }

</bundles_post_ra>
